<compile_context>
chip_gen: v7x
topology: tpu7x:2x2x1
jax: 0.10.0
libtpu: 0.0.40
codegen_flags: <defaults>
</compile_context>

<pallas_src>
import jax
import jax.numpy as jnp
from jax.experimental import pallas as pl
from jax.experimental.pallas import tpu as pltpu


def mlp_kernel(x_ref,
               w1_ref, b1_ref,
               w2_ref, b2_ref,
               w3_ref, b3_ref,
               w4t_ref, b4_ref,
               out_ref):
    """One batch tile: (TB, p) -> (TB, 1). Weights stay resident across grid steps."""
    x = x_ref[...]  # already f32; no redundant cast

    # fc1 -> relu  (dropout = identity, eval semantics)
    h1 = jnp.maximum(
        jnp.dot(x, w1_ref[...], preferred_element_type=jnp.float32) + b1_ref[...], 0.0)
    # fc2 -> relu
    h2 = jnp.maximum(
        jnp.dot(h1, w2_ref[...], preferred_element_type=jnp.float32) + b2_ref[...], 0.0)
    # fc3 -> relu
    h3 = jnp.maximum(
        jnp.dot(h2, w3_ref[...], preferred_element_type=jnp.float32) + b3_ref[...], 0.0)

    # fc4 (out_features == 1): broadcast-mul + lane reduction on the VPU/XLU
    # instead of an N=1 matmul that would fill 1/128..1/256 of the MXU columns.
    a4 = jnp.sum(h3 * w4t_ref[...], axis=-1, keepdims=True) + b4_ref[0, 0]

    # Numerically stable sigmoid; exp runs on the otherwise-idle EUP slot.
    out_ref[...] = jax.nn.sigmoid(a4).astype(out_ref.dtype)


def mynn_forward(x, params, *, block_b=128):
    """x: (B, p) float32; params: dict of w1..w4, b1..b4 (PyTorch-equivalent layout)."""
    B, p = x.shape
    w1, b1 = params["w1"], params["b1"]
    w2, b2 = params["w2"], params["b2"]
    w3, b3 = params["w3"], params["b3"]
    w4, b4 = params["w4"], params["b4"]

    # fc4 weight as a (1, p) row for the in-kernel VPU reduction.
    w4t = w4.reshape(1, p)

    # Batch tile: full batch if small, else a sublane-aligned block.
    if B <= block_b:
        tb = B
    else:
        assert block_b % 8 == 0, "batch tile must be a multiple of 8 sublanes"
        assert B % block_b == 0, "keep B a multiple of the batch tile"
        tb = block_b
    grid = (pl.cdiv(B, tb),)

    # x / out are tiled over the batch grid axis; all weights & biases use a
    # constant index_map so they are fetched once and stay resident in VMEM.
    x_spec = pl.BlockSpec((tb, p), lambda i: (i, 0))
    out_spec = pl.BlockSpec((tb, 1), lambda i: (i, 0))
    const = lambda shape: pl.BlockSpec(shape, lambda i: tuple(0 for _ in shape))
    smem_spec = pl.BlockSpec(memory_space=pltpu.MemorySpace.SMEM)  # tiny (1,1) fc4 bias

    return pl.pallas_call(
        mlp_kernel,
        out_shape=jax.ShapeDtypeStruct((B, 1), jnp.float32),
        grid_spec=pltpu.PrefetchScalarGridSpec(
            num_scalar_prefetch=0,
            grid=grid,
            in_specs=[
                x_spec,
                const(w1.shape), const(b1.shape),
                const(w2.shape), const(b2.shape),
                const(w3.shape), const(b3.shape),
                const(w4t.shape), smem_spec,
            ],
            out_specs=out_spec,
        ),
        compiler_params=pltpu.CompilerParams(
            # batch axis is embarrassingly parallel -> sharded across v7x's 2 TCs
            dimension_semantics=("parallel",),
        ),
    )(x, w1, b1, w2, b2, w3, b3, w4t, b4)


def init_params(p, key):
    """Deterministic init mimicking nn.Linear's U(-1/sqrt(fan_in), 1/sqrt(fan_in))."""
    keys = jax.random.split(key, 8)
    params = {}
    dims = [(p, p), (p, p), (p, p), (p, 1)]
    for i, (fan_in, fan_out) in enumerate(dims, start=1):
        bound = 1.0 / jnp.sqrt(fan_in)
        params[f"w{i}"] = jax.random.uniform(
            keys[2 * (i - 1)], (fan_in, fan_out), jnp.float32, -bound, bound)
        params[f"b{i}"] = jax.random.uniform(
            keys[2 * (i - 1) + 1], (1, fan_out), jnp.float32, -bound, bound)
    return params


def reference_forward(x, params):
    h = x
    for i in range(1, 4):
        h = jnp.maximum(h @ params[f"w{i}"] + params[f"b{i}"], 0.0)
    a4 = h @ params["w4"] + params["b4"]
    return jax.nn.sigmoid(a4)


if __name__ == "__main__":
    p = 32
    key = jax.random.PRNGKey(0)
    k_x, k_p, k_x2 = jax.random.split(key, 3)
    params = init_params(p, k_p)

    # Batched case: exercises the batch-tiled grid (grid=(2,), TB=128).
    B = 256
    x = jax.random.normal(k_x, (B, p), jnp.float32)
    y = jax.block_until_ready(mynn_forward(x, params))
    y_ref = reference_forward(x, params)
    assert y.shape == (B, 1)
    assert jnp.allclose(y, y_ref, atol=1e-5, rtol=1e-5), "batched mismatch vs JAX reference"

    # Tiny-batch case: full-batch single grid step still works.
    x_small = jax.random.normal(k_x2, (8, p), jnp.float32)
    y_small = jax.block_until_ready(mynn_forward(x_small, params))
    y_small_ref = reference_forward(x_small, params)
    assert y_small.shape == (8, 1)
    assert jnp.allclose(y_small, y_small_ref, atol=1e-5, rtol=1e-5), "small-batch mismatch"

    print("KERNEL_OK")
</pallas_src>

<mosaic_0001>
module attributes {stable_mosaic.version = 11 : i64} {
  func.func @mlp_kernel(%arg0: i32, %arg1: memref<128x32xf32, #tpu.memory_space<vmem>>, %arg2: memref<32x32xf32, #tpu.memory_space<vmem>>, %arg3: memref<1x32xf32, #tpu.memory_space<vmem>>, %arg4: memref<32x32xf32, #tpu.memory_space<vmem>>, %arg5: memref<1x32xf32, #tpu.memory_space<vmem>>, %arg6: memref<32x32xf32, #tpu.memory_space<vmem>>, %arg7: memref<1x32xf32, #tpu.memory_space<vmem>>, %arg8: memref<1x32xf32, #tpu.memory_space<vmem>>, %arg9: memref<1x1xf32, #tpu.memory_space<smem>>, %arg10: memref<128x1xf32, #tpu.memory_space<vmem>>) attributes {dimension_semantics = [#tpu.dimension_semantics<parallel>], iteration_bounds = array<i64: 2>, scalar_prefetch = 0 : i64, scratch_operands = 0 : i64, tpu.core_type = #tpu.core_type<tc>, window_params = [{transform_indices = @transform_0, window_bounds = array<i64: 128, 32>}, {pipeline_mode = #tpu.pipeline_mode<synchronous>, transform_indices = @transform_1, window_bounds = array<i64: 32, 32>}, {pipeline_mode = #tpu.pipeline_mode<synchronous>, transform_indices = @transform_2, window_bounds = array<i64: 1, 32>}, {pipeline_mode = #tpu.pipeline_mode<synchronous>, transform_indices = @transform_3, window_bounds = array<i64: 32, 32>}, {pipeline_mode = #tpu.pipeline_mode<synchronous>, transform_indices = @transform_4, window_bounds = array<i64: 1, 32>}, {pipeline_mode = #tpu.pipeline_mode<synchronous>, transform_indices = @transform_5, window_bounds = array<i64: 32, 32>}, {pipeline_mode = #tpu.pipeline_mode<synchronous>, transform_indices = @transform_6, window_bounds = array<i64: 1, 32>}, {pipeline_mode = #tpu.pipeline_mode<synchronous>, transform_indices = @transform_7, window_bounds = array<i64: 1, 32>}, {transform_indices = @transform_8, window_bounds = array<i64: 1, 1>}, {transform_indices = @transform_9, window_bounds = array<i64: 128, 1>}]} {
    %c0 = arith.constant 0 : index
    %c0_0 = arith.constant 0 : index
    %0 = vector.load %arg1[%c0, %c0_0] : memref<128x32xf32, #tpu.memory_space<vmem>>, vector<128x32xf32>
    %c0_1 = arith.constant 0 : index
    %c0_2 = arith.constant 0 : index
    %1 = vector.load %arg2[%c0_1, %c0_2] : memref<32x32xf32, #tpu.memory_space<vmem>>, vector<32x32xf32>
    %cst = arith.constant dense<0.000000e+00> : vector<128x32xf32>
    %2 = tpu.matmul %0, %1, %cst {dimension_numbers = #tpu.dot_dimension_numbers<[1], [0], [0], [1], [0, 0, 1, 1], [], []>} : vector<128x32xf32>, vector<32x32xf32>, vector<128x32xf32> -> vector<128x32xf32>
    %c0_3 = arith.constant 0 : index
    %c0_4 = arith.constant 0 : index
    %3 = vector.load %arg3[%c0_3, %c0_4] : memref<1x32xf32, #tpu.memory_space<vmem>>, vector<1x32xf32>
    %4 = vector.broadcast %3 : vector<1x32xf32> to vector<128x32xf32>
    %5 = arith.addf %2, %4 : vector<128x32xf32>
    %cst_5 = arith.constant 0.000000e+00 : f32
    %6 = vector.broadcast %cst_5 : f32 to vector<128x32xf32>
    %7 = arith.maximumf %5, %6 : vector<128x32xf32>
    %c0_6 = arith.constant 0 : index
    %c0_7 = arith.constant 0 : index
    %8 = vector.load %arg4[%c0_6, %c0_7] : memref<32x32xf32, #tpu.memory_space<vmem>>, vector<32x32xf32>
    %cst_8 = arith.constant dense<0.000000e+00> : vector<128x32xf32>
    %9 = tpu.matmul %7, %8, %cst_8 {dimension_numbers = #tpu.dot_dimension_numbers<[1], [0], [0], [1], [0, 0, 1, 1], [], []>} : vector<128x32xf32>, vector<32x32xf32>, vector<128x32xf32> -> vector<128x32xf32>
    %c0_9 = arith.constant 0 : index
    %c0_10 = arith.constant 0 : index
    %10 = vector.load %arg5[%c0_9, %c0_10] : memref<1x32xf32, #tpu.memory_space<vmem>>, vector<1x32xf32>
    %11 = vector.broadcast %10 : vector<1x32xf32> to vector<128x32xf32>
    %12 = arith.addf %9, %11 : vector<128x32xf32>
    %cst_11 = arith.constant 0.000000e+00 : f32
    %13 = vector.broadcast %cst_11 : f32 to vector<128x32xf32>
    %14 = arith.maximumf %12, %13 : vector<128x32xf32>
    %c0_12 = arith.constant 0 : index
    %c0_13 = arith.constant 0 : index
    %15 = vector.load %arg6[%c0_12, %c0_13] : memref<32x32xf32, #tpu.memory_space<vmem>>, vector<32x32xf32>
    %cst_14 = arith.constant dense<0.000000e+00> : vector<128x32xf32>
    %16 = tpu.matmul %14, %15, %cst_14 {dimension_numbers = #tpu.dot_dimension_numbers<[1], [0], [0], [1], [0, 0, 1, 1], [], []>} : vector<128x32xf32>, vector<32x32xf32>, vector<128x32xf32> -> vector<128x32xf32>
    %c0_15 = arith.constant 0 : index
    %c0_16 = arith.constant 0 : index
    %17 = vector.load %arg7[%c0_15, %c0_16] : memref<1x32xf32, #tpu.memory_space<vmem>>, vector<1x32xf32>
    %18 = vector.broadcast %17 : vector<1x32xf32> to vector<128x32xf32>
    %19 = arith.addf %16, %18 : vector<128x32xf32>
    %cst_17 = arith.constant 0.000000e+00 : f32
    %20 = vector.broadcast %cst_17 : f32 to vector<128x32xf32>
    %21 = arith.maximumf %19, %20 : vector<128x32xf32>
    %c0_18 = arith.constant 0 : index
    %c0_19 = arith.constant 0 : index
    %22 = vector.load %arg8[%c0_18, %c0_19] : memref<1x32xf32, #tpu.memory_space<vmem>>, vector<1x32xf32>
    %23 = vector.broadcast %22 : vector<1x32xf32> to vector<128x32xf32>
    %24 = arith.mulf %21, %23 : vector<128x32xf32>
    %cst_20 = arith.constant dense<0.000000e+00> : vector<128xf32>
    %25 = vector.multi_reduction <add>, %24, %cst_20 [1] : vector<128x32xf32> to vector<128xf32>
    %26 = vector.shape_cast %25 : vector<128xf32> to vector<128x1xf32>
    %c0_21 = arith.constant 0 : index
    %c0_22 = arith.constant 0 : index
    %27 = memref.load %arg9[%c0_21, %c0_22] : memref<1x1xf32, #tpu.memory_space<smem>>
    %28 = vector.broadcast %27 : f32 to vector<128x1xf32>
    %29 = arith.addf %26, %28 : vector<128x1xf32>
    %30 = arith.negf %29 : vector<128x1xf32>
    %31 = math.exp %30 : vector<128x1xf32>
    %cst_23 = arith.constant 1.000000e+00 : f32
    %32 = vector.broadcast %cst_23 : f32 to vector<128x1xf32>
    %33 = arith.addf %32, %31 : vector<128x1xf32>
    %34 = arith.divf %32, %33 : vector<128x1xf32>
    %c0_24 = arith.constant 0 : index
    %c0_25 = arith.constant 0 : index
    %35 = vector.load %arg10[%c0_24, %c0_25] : memref<128x1xf32, #tpu.memory_space<vmem>>, vector<128x1xf32>
    tpu.vector_store %arg10[%c0_24, %c0_25], %34 {strides = array<i32>} : memref<128x1xf32, #tpu.memory_space<vmem>>, vector<128x1xf32>,
    return
  }
  func.func @transform_0(%arg0: i32) -> (i32, i32) {
    %c0_i32 = arith.constant 0 : i32
    %c0_i32_0 = arith.constant 0 : i32
    return %arg0, %c0_i32 : i32, i32
  }
  func.func @transform_1(%arg0: i32) -> (i32, i32) {
    %c0_i32 = arith.constant 0 : i32
    %c0_i32_0 = arith.constant 0 : i32
    %c0_i32_1 = arith.constant 0 : i32
    return %c0_i32, %c0_i32_0 : i32, i32
  }
  func.func @transform_2(%arg0: i32) -> (i32, i32) {
    %c0_i32 = arith.constant 0 : i32
    %c0_i32_0 = arith.constant 0 : i32
    %c0_i32_1 = arith.constant 0 : i32
    return %c0_i32, %c0_i32_0 : i32, i32
  }
  func.func @transform_3(%arg0: i32) -> (i32, i32) {
    %c0_i32 = arith.constant 0 : i32
    %c0_i32_0 = arith.constant 0 : i32
    %c0_i32_1 = arith.constant 0 : i32
    return %c0_i32, %c0_i32_0 : i32, i32
  }
  func.func @transform_4(%arg0: i32) -> (i32, i32) {
    %c0_i32 = arith.constant 0 : i32
    %c0_i32_0 = arith.constant 0 : i32
    %c0_i32_1 = arith.constant 0 : i32
    return %c0_i32, %c0_i32_0 : i32, i32
  }
  func.func @transform_5(%arg0: i32) -> (i32, i32) {
    %c0_i32 = arith.constant 0 : i32
    %c0_i32_0 = arith.constant 0 : i32
    %c0_i32_1 = arith.constant 0 : i32
    return %c0_i32, %c0_i32_0 : i32, i32
  }
  func.func @transform_6(%arg0: i32) -> (i32, i32) {
    %c0_i32 = arith.constant 0 : i32
    %c0_i32_0 = arith.constant 0 : i32
    %c0_i32_1 = arith.constant 0 : i32
    return %c0_i32, %c0_i32_0 : i32, i32
  }
  func.func @transform_7(%arg0: i32) -> (i32, i32) {
    %c0_i32 = arith.constant 0 : i32
    %c0_i32_0 = arith.constant 0 : i32
    %c0_i32_1 = arith.constant 0 : i32
    return %c0_i32, %c0_i32_0 : i32, i32
  }
  func.func @transform_8(%arg0: i32) -> (i32, i32) {
    %c0_i32 = arith.constant 0 : i32
    %c0_i32_0 = arith.constant 0 : i32
    %c0_i32_1 = arith.constant 0 : i32
    return %c0_i32, %c0_i32_0 : i32, i32
  }
  func.func @transform_9(%arg0: i32) -> (i32, i32) {
    %c0_i32 = arith.constant 0 : i32
    %c0_i32_0 = arith.constant 0 : i32
    return %arg0, %c0_i32 : i32, i32
  }
}

</mosaic_0001>

<bundles_post_ra>
// kernel: tpu_custom_call.1
= control target key start
LH: loop header
LB: loop body
LE: loop exit
PB: predicated region body
PF: predicated region fallthrough
CT: control target
= control target key end

     0   :  { %s1668_s11 = smov 0   ;;  %s1910_s0 = inlined_call_operand.vmem [shape: f32[256,32], index: 0, kind: input, shape index: {}]   ;;  %s1911_s1 = inlined_call_operand.vmem [shape: f32[32,32], index: 1, kind: input, shape index: {}]   ;;  %s1912_s2 = inlined_call_operand.vmem [shape: f32[1,32], index: 2, kind: input, shape index: {}]   ;;  %s1913_s3 = inlined_call_operand.vmem [shape: f32[32,32], index: 3, kind: input, shape index: {}]   ;;  %s1914_s4 = inlined_call_operand.vmem [shape: f32[1,32], index: 4, kind: input, shape index: {}]   ;;  %s1915_s5 = inlined_call_operand.vmem [shape: f32[32,32], index: 5, kind: input, shape index: {}]   ;;  %s1916_s6 = inlined_call_operand.vmem [shape: f32[1,32], index: 6, kind: input, shape index: {}]   ;;  %s1917_s7 = inlined_call_operand.vmem [shape: f32[1,32], index: 7, kind: input, shape index: {}]   ;;  %s1918_s8 = inlined_call_operand.<no memory space> [shape: f32[1,1], index: 8, kind: input, shape index: {}]   ;;  %s1919_s9 = inlined_call_operand.vmem [shape: f32[256,1], index: 9, kind: output, shape index: {}]  }
   0x1   :  { %14 = sst [smem:[#allocation2]] %s1918_s8 }
   0x2 LB: > { %s1272_s12 = sadd.s32 4294967295, %s1613_s11   ;;  %p1276_p0 = scmp.ge.s32.totalorder %s1613_s11, 1  ;;  %s1613_s11 = sphi %s1668_s11, %s20_s11  }
   0x3   : > { %p289_p1 = scmp.lt.s32.totalorder %s1613_s11, 3 }
   0x5   : > { %p290_p2 = pnand %p1276_p0, %p289_p1 }
   0x6   : > { %v353_v0 = vld [vmem:[%s1911_s1] sm:$0xff] (!%p290_p2)  ;;  %v354_v1 = vld [vmem:[%s1911_s1 + $0x8] sm:$0xff] (!%p290_p2)  ;;  %v355_v2 = vld [vmem:[%s1911_s1 + $0x10] sm:$0xff] (!%p290_p2)  ;;  %s1277_s18 = sshll.u32 (!%p290_p2), %s1272_s12, 4  ;;  %vm364_vm0 = vcmask (!%p290_p2), 261120   ;;  %s1085_s30 = sld [smem:[#allocation2]] (!%p290_p2) }
   0x7   : > { %293 = sbr.rel (%p290_p2) target bundleno = 879 (0x36f), region = 56  ;;  %v1507_v3 = vpack.c.bf16 (!%p290_p2), %v354_v1, %v353_v0  ;;  %v356_v4 = vld [vmem:[%s1911_s1 + $0x18] sm:$0xff] (!%p290_p2)  ;;  %p326_p3 = scmp.lt.s32.totalorder (!%p290_p2), %s1277_s18, 31  ;;  %v574_v6 = vld [vmem:[%s1913_s3] sm:$0xff] (!%p290_p2)  ;;  %v575_v7 = vld [vmem:[%s1913_s3 + $0x8] sm:$0xff] (!%p290_p2)  ;;  %vm1199_vm1 = vcmask (!%p290_p2), 7168  }
   0x8   : > { %v1511_v5 = vpack.c.bf16 (!%p290_p2), %v356_v4, %v355_v2  ;;  %v1515_v8 = vpack.c.bf16 (!%p290_p2), %v575_v7, %v574_v6  ;;  %v576_v10 = vld [vmem:[%s1913_s3 + $0x10] sm:$0xff] (!%p290_p2)  ;;  %v577_v11 = vld [vmem:[%s1913_s3 + $0x18] sm:$0xff] (!%p290_p2)  ;;  %v794_v28 = vld [vmem:[%s1915_s5] sm:$0xff] (!%p290_p2) }
   0x9   : > { %1508 = vmatprep.subr.bf16.mxu0 (!%p290_p2), %v1507_v3  ;;  %1531 = vmatprep.subr.bf16.mxu1 (!%p290_p2), %v1507_v3  ;;  %v1519_v17 = vpack.c.bf16 (!%p290_p2), %v577_v11, %v576_v10  ;;  %v795_v29 = vld [vmem:[%s1915_s5 + $0x8] sm:$0xff] (!%p290_p2)  ;;  %v796_v30 = vld [vmem:[%s1915_s5 + $0x10] sm:$0xff] (!%p290_p2)  ;;  %v797_v32 = vld [vmem:[%s1915_s5 + $0x18] sm:$0xff] (!%p290_p2) }
   0xa   : > { %1510 = vmatpush3.bf16.msra.mxu0 (!%p290_p2), %v1507_v3  ;;  %1533 = vmatpush3.bf16.msra.mxu1 (!%p290_p2), %v1507_v3  ;;  %v1523_v31 = vpack.c.bf16 (!%p290_p2), %v795_v29, %v794_v28  ;;  %v1527_v33 = vpack.c.bf16 (!%p290_p2), %v797_v32, %v796_v30  ;;  %v1281_v34 = vld [vmem:[%s1912_s2] ss:$0 sm:$0xff] (!%p290_p2) }
   0xb   : > { %1512 = vmatprep.subr.bf16.mxu0 (!%p290_p2), %v1511_v5  ;;  %1532 = vmatprep.subr.bf16.mxu1 (!%p290_p2), %v1511_v5 }
   0xe   : > { %s1921_s18 = smov (!%p326_p3, %s1277_s18), 31  ;;  %1514 = vmatpush3.bf16.msra.mxu0 %v1511_v5  ;;  %1534 = vmatpush3.bf16.msra.mxu1 %v1511_v5 }
   0xf   : > { %s1278_s25 = sshll.u32 %s1921_s18, 3  ;;  %1516 = vmatprep.subr.bf16.mxu1 %v1515_v8  ;;  %1524 = vmatprep.subr.bf16.mxu0 %v1523_v31 }
  0x10   : > { %s1702_s28 = scalar_lea.vmem %s1910_s0, %s1278_s25  ;;  %s1869_s13 = scalar_lea.vmem %s1919_s9, %s1278_s25 }
  0x11   : > { %v337_v9 = vld [vmem:[%s1702_s28] sm:$0xff]  ;;  %v338_v12 = vld [vmem:[%s1702_s28 + $0x8] sm:$0xff]  ;;  %v339_v13 = vld [vmem:[%s1702_s28 + $0x10] sm:$0xff] }
  0x12   : > { %1419 = vmatprep.mubr.msk.f32.mxu0 %vm364_vm0, %v337_v9  ;;  %v345_v14 = vld [vmem:[%s1702_s28 + $0x40] sm:$0xff]  ;;  %v346_v15 = vld [vmem:[%s1702_s28 + $0x48] sm:$0xff]  ;;  %v347_v16 = vld [vmem:[%s1702_s28 + $0x50] sm:$0xff] }
  0x13   : > { %1431 = vmatprep.mubr.msk.f32.mxu1 %vm364_vm0, %v345_v14  ;;  %1420 = vmatmul.mubr.msk.f32.vlgmr.msra.gmra.mrb[0].mxu0 %vm364_vm0, %v338_v12  ;;  %v340_v18 = vld [vmem:[%s1702_s28 + $0x18] sm:$0xff]  ;;  %v341_v19 = vld [vmem:[%s1702_s28 + $0x20] sm:$0xff]  ;;  %v342_v22 = vld [vmem:[%s1702_s28 + $0x28] sm:$0xff] }
  0x14   : > { %1422 = vmatprep.mubr.msk.f32.mxu0 %vm364_vm0, %v339_v13  ;;  %1432 = vmatmul.mubr.msk.f32.vlgmr.msra.gmra.mrb[0].mxu1 %vm364_vm0, %v346_v15  ;;  %v348_v20 = vld [vmem:[%s1702_s28 + $0x58] sm:$0xff]  ;;  %v349_v21 = vld [vmem:[%s1702_s28 + $0x60] sm:$0xff]  ;;  %v343_v23 = vld [vmem:[%s1702_s28 + $0x30] sm:$0xff] }
  0x15   : > { %1434 = vmatprep.mubr.msk.f32.mxu1 %vm364_vm0, %v347_v16  ;;  %1518 = vmatpush3.bf16.msra.mxu1 %v1515_v8  ;;  %v350_v24 = vld [vmem:[%s1702_s28 + $0x68] sm:$0xff]  ;;  %v351_v25 = vld [vmem:[%s1702_s28 + $0x70] sm:$0xff]  ;;  %v344_v26 = vld [vmem:[%s1702_s28 + $0x38] sm:$0xff] }
  0x16   : > { %1520 = vmatprep.subr.bf16.mxu1 %v1519_v17  ;;  %v352_v27 = vld [vmem:[%s1702_s28 + $0x78] sm:$0xff]  ;;  %1526 = vmatpush3.bf16.msra.mxu0 %v1523_v31 }
  0x17   : > { %1423 = vmatmul.mubr.msk.f32.gmra.mrb[2].mxu0 %vm364_vm0, %v340_v18  ;;  %1528 = vmatprep.subr.bf16.mxu0 %v1527_v33 }
  0x18   : > { %1425 = vmatprep.mubr.msk.f32.mxu0 %vm364_vm0, %v341_v19  ;;  %1435 = vmatmul.mubr.msk.f32.gmra.mrb[2].mxu1 %vm364_vm0, %v348_v20  ;;  %v1298_v19 = vld [vmem:[%s1914_s4] ss:$0 sm:$0xff] }
  0x19   : > { %1437 = vmatprep.mubr.msk.f32.mxu1 %vm364_vm0, %v349_v21  ;;  %1522 = vmatpush3.bf16.msra.mxu1 %v1519_v17 }
  0x1a   : > { %1530 = vmatpush3.bf16.msra.mxu0 %v1527_v33 }
  0x1b   : > { %1426 = vmatmul.mubr.msk.f32.gmra.mrb[4].mxu0 %vm364_vm0, %v342_v22 }
  0x1c   : > { %1428 = vmatprep.mubr.msk.f32.mxu0 %vm364_vm0, %v343_v23  ;;  %1438 = vmatmul.mubr.msk.f32.gmra.mrb[4].mxu1 %vm364_vm0, %v350_v24 }
  0x1d   : > { %1440 = vmatprep.mubr.msk.f32.mxu1 %vm364_vm0, %v351_v25 }
  0x1f   : > { %1429 = vmatmul.mubr.msk.f32.gmra.mrb[6].mxu0 %vm364_vm0, %v344_v26 }
  0x20   : > { %1441 = vmatmul.mubr.msk.f32.gmra.mrb[6].mxu1 %vm364_vm0, %v352_v27 }
  0xe6   : > { %v1421_v35 = vpop.f32.mrb[0].mxu0 }
  0xe7   : > { %v485_v36 = vadd.f32 %v1421_v35, %v1281_v34  ;;  %v479_v37 = vpop.f32.mrb[1].mxu0  ;;  %v1433_v38 = vpop.f32.mrb[0].mxu1 }
  0xe8   : > { %v480_v39 = vadd.f32 %v1281_v34, %v479_v37  ;;  %v519_v40 = vpop.f32.mrb[1].mxu1  ;;  %v525_v3 = vadd.f32 %v1433_v38, %v1281_v34 }
  0xe9   : > { %v559_v43 = vmax.f32 %v485_v36, 0.0  ;;  %v520_v60 = vadd.f32 %v1281_v34, %v519_v40 }
  0xea   : > { %v558_v41 = vmax.f32 %v480_v39, 0.0  ;;  %v1424_v42 = vpop.f32.mrb[2].mxu0  ;;  %v567_v7 = vmax.f32 %v525_v3, 0.0 }
  0xeb   : > { %v495_v44 = vadd.f32 %v1424_v42, %v1281_v34  ;;  %v489_v45 = vpop.f32.mrb[3].mxu0  ;;  %v1436_v46 = vpop.f32.mrb[2].mxu1  ;;  %v566_v5 = vmax.f32 %v520_v60, 0.0 }
  0xec   : > { %v490_v47 = vadd.f32 %v1281_v34, %v489_v45  ;;  %1451 = vmatprep.mubr.msk.f32.mxu1 %vm364_vm0, %v558_v41  ;;  %v529_v48 = vpop.f32.mrb[3].mxu1  ;;  %v535_v8 = vadd.f32 %v1436_v46, %v1281_v34 }
  0xed   : > { %1452 = vmatmul.mubr.msk.f32.vlgmr.msra.gmra.mrb[8].mxu1 %vm364_vm0, %v559_v43  ;;  %v561_v51 = vmax.f32 %v495_v44, 0.0  ;;  %v530_v6 = vadd.f32 %v1281_v34, %v529_v48 }
  0xee   : > { %v560_v49 = vmax.f32 %v490_v47, 0.0  ;;  %v1427_v50 = vpop.f32.mrb[4].mxu0  ;;  %v569_v11 = vmax.f32 %v535_v8, 0.0 }
  0xef   : > { %v505_v52 = vadd.f32 %v1427_v50, %v1281_v34  ;;  %v499_v53 = vpop.f32.mrb[5].mxu0  ;;  %v1439_v54 = vpop.f32.mrb[4].mxu1  ;;  %v568_v9 = vmax.f32 %v530_v6, 0.0 }
  0xf0   : > { %v500_v55 = vadd.f32 %v1281_v34, %v499_v53  ;;  %1454 = vmatprep.mubr.msk.f32.mxu1 %vm364_vm0, %v560_v49  ;;  %v539_v56 = vpop.f32.mrb[5].mxu1  ;;  %v545_v12 = vadd.f32 %v1439_v54, %v1281_v34 }
  0xf1   : > { %v563_v57 = vmax.f32 %v505_v52, 0.0  ;;  %1455 = vmatmul.mubr.msk.f32.gmra.mrb[10].mxu1 %vm364_vm0, %v561_v51  ;;  %v540_v10 = vadd.f32 %v1281_v34, %v539_v56 }
  0xf2   : > { %v562_v58 = vmax.f32 %v500_v55, 0.0  ;;  %v1430_v59 = vpop.f32.mrb[6].mxu0  ;;  %v571_v15 = vmax.f32 %v545_v12, 0.0 }
  0xf3   : > { %v515_v61 = vadd.f32 %v1430_v59, %v1281_v34  ;;  %v509_v62 = vpop.f32.mrb[7].mxu0  ;;  %v1442_v63 = vpop.f32.mrb[6].mxu1  ;;  %v570_v13 = vmax.f32 %v540_v10, 0.0 }
  0xf4   : > { %v510_v0 = vadd.f32 %v1281_v34, %v509_v62  ;;  %1457 = vmatprep.mubr.msk.f32.mxu1 %vm364_vm0, %v562_v58  ;;  %v549_v1 = vpop.f32.mrb[7].mxu1  ;;  %v555_v16 = vadd.f32 %v1442_v63, %v1281_v34 }
  0xf5   : > { %v565_v2 = vmax.f32 %v515_v61, 0.0  ;;  %1458 = vmatmul.mubr.msk.f32.gmra.mrb[12].mxu1 %vm364_vm0, %v563_v57  ;;  %v550_v14 = vadd.f32 %v1281_v34, %v549_v1 }
  0xf6   : > { %v564_v4 = vmax.f32 %v510_v0, 0.0  ;;  %v573_v18 = vmax.f32 %v555_v16, 0.0 }
  0xf7   : > { %v572_v17 = vmax.f32 %v550_v14, 0.0 }
  0xf8   : > { %1460 = vmatprep.mubr.msk.f32.mxu1 %vm364_vm0, %v564_v4  ;;  %v1795_v4 = vld [vmem:[%s1916_s6] ss:$0 sm:$0xff] }
  0xf9   : > { %1461 = vmatmul.mubr.msk.f32.gmra.mrb[14].mxu1 %vm364_vm0, %v565_v2 }
  0xfa   : > { %1463 = vmatprep.mubr.msk.f32.mxu1 %vm364_vm0, %v566_v5 }
  0xfd   : > { %1464 = vmatmul.mubr.msk.f32.gmra.mrb[16].mxu1 %vm364_vm0, %v567_v7 }
  0xfe   : > { %1466 = vmatprep.mubr.msk.f32.mxu1 %vm364_vm0, %v568_v9  ;;  %v1802_v9 = vld [vmem:[%s1917_s7] ss:$0 sm:$0xff] }
 0x101   : > { %1467 = vmatmul.mubr.msk.f32.gmra.mrb[18].mxu1 %vm364_vm0, %v569_v11 }
 0x102   : > { %1469 = vmatprep.mubr.msk.f32.mxu1 %vm364_vm0, %v570_v13 }
 0x105   : > { %1470 = vmatmul.mubr.msk.f32.gmra.mrb[20].mxu1 %vm364_vm0, %v571_v15 }
 0x106   : > { %1472 = vmatprep.mubr.msk.f32.mxu1 %vm364_vm0, %v572_v17 }
 0x109   : > { %1473 = vmatmul.mubr.msk.f32.gmra.mrb[22].mxu1 %vm364_vm0, %v573_v18 }
 0x1c0   : > { %v1453_v20 = vpop.f32.mrb[8].mxu1 }
 0x1c1   : > { %v705_v21 = vadd.f32 %v1453_v20, %v1298_v19  ;;  %v699_v22 = vpop.f32.mrb[9].mxu1 }
 0x1c2   : > { %v700_v23 = vadd.f32 %v1298_v19, %v699_v22 }
 0x1c3   : > { %v779_v26 = vmax.f32 %v705_v21, 0.0 }
 0x1c4   : > { %v778_v24 = vmax.f32 %v700_v23, 0.0  ;;  %v1456_v25 = vpop.f32.mrb[10].mxu1 }
 0x1c5   : > { %v715_v27 = vadd.f32 %v1456_v25, %v1298_v19  ;;  %v709_v28 = vpop.f32.mrb[11].mxu1 }
 0x1c6   : > { %v710_v29 = vadd.f32 %v1298_v19, %v709_v28  ;;  %1483 = vmatprep.mubr.msk.f32.mxu0 %vm364_vm0, %v778_v24 }
 0x1c7   : > { %1484 = vmatmul.mubr.msk.f32.vlgmr.msra.gmra.mrb[8].mxu0 %vm364_vm0, %v779_v26  ;;  %v781_v32 = vmax.f32 %v715_v27, 0.0 }
 0x1c8   : > { %v780_v30 = vmax.f32 %v710_v29, 0.0  ;;  %v1459_v31 = vpop.f32.mrb[12].mxu1 }
 0x1c9   : > { %v725_v33 = vadd.f32 %v1459_v31, %v1298_v19  ;;  %v719_v34 = vpop.f32.mrb[13].mxu1 }
 0x1ca   : > { %v720_v35 = vadd.f32 %v1298_v19, %v719_v34  ;;  %1486 = vmatprep.mubr.msk.f32.mxu0 %vm364_vm0, %v780_v30 }
 0x1cb   : > { %v783_v36 = vmax.f32 %v725_v33, 0.0  ;;  %1487 = vmatmul.mubr.msk.f32.gmra.mrb[10].mxu0 %vm364_vm0, %v781_v32 }
 0x1cc   : > { %v782_v37 = vmax.f32 %v720_v35, 0.0  ;;  %v1462_v38 = vpop.f32.mrb[14].mxu1 }
 0x1cd   : > { %v735_v39 = vadd.f32 %v1462_v38, %v1298_v19  ;;  %v729_v40 = vpop.f32.mrb[15].mxu1 }
 0x1ce   : > { %v730_v41 = vadd.f32 %v1298_v19, %v729_v40  ;;  %1489 = vmatprep.mubr.msk.f32.mxu0 %vm364_vm0, %v782_v37 }
 0x1cf   : > { %v785_v42 = vmax.f32 %v735_v39, 0.0  ;;  %1490 = vmatmul.mubr.msk.f32.gmra.mrb[12].mxu0 %vm364_vm0, %v783_v36 }
 0x1d0   : > { %v784_v43 = vmax.f32 %v730_v41, 0.0  ;;  %v1465_v44 = vpop.f32.mrb[16].mxu1 }
 0x1d1   : > { %v745_v45 = vadd.f32 %v1465_v44, %v1298_v19  ;;  %v739_v46 = vpop.f32.mrb[17].mxu1 }
 0x1d2   : > { %v740_v47 = vadd.f32 %v1298_v19, %v739_v46  ;;  %1492 = vmatprep.mubr.msk.f32.mxu0 %vm364_vm0, %v784_v43 }
 0x1d3   : > { %v787_v48 = vmax.f32 %v745_v45, 0.0  ;;  %1493 = vmatmul.mubr.msk.f32.gmra.mrb[14].mxu0 %vm364_vm0, %v785_v42 }
 0x1d4   : > { %v786_v49 = vmax.f32 %v740_v47, 0.0  ;;  %v1468_v50 = vpop.f32.mrb[18].mxu1 }
 0x1d5   : > { %v755_v51 = vadd.f32 %v1468_v50, %v1298_v19  ;;  %v749_v52 = vpop.f32.mrb[19].mxu1 }
 0x1d6   : > { %v750_v53 = vadd.f32 %v1298_v19, %v749_v52  ;;  %1495 = vmatprep.mubr.msk.f32.mxu0 %vm364_vm0, %v786_v49 }
 0x1d7   : > { %v789_v54 = vmax.f32 %v755_v51, 0.0  ;;  %1496 = vmatmul.mubr.msk.f32.gmra.mrb[16].mxu0 %vm364_vm0, %v787_v48 }
 0x1d8   : > { %v788_v55 = vmax.f32 %v750_v53, 0.0  ;;  %v1471_v56 = vpop.f32.mrb[20].mxu1 }
 0x1d9   : > { %v765_v57 = vadd.f32 %v1471_v56, %v1298_v19  ;;  %v759_v58 = vpop.f32.mrb[21].mxu1 }
 0x1da   : > { %v760_v59 = vadd.f32 %v1298_v19, %v759_v58  ;;  %1498 = vmatprep.mubr.msk.f32.mxu0 %vm364_vm0, %v788_v55 }
 0x1db   : > { %v791_v60 = vmax.f32 %v765_v57, 0.0  ;;  %1499 = vmatmul.mubr.msk.f32.gmra.mrb[18].mxu0 %vm364_vm0, %v789_v54 }
 0x1dc   : > { %v790_v61 = vmax.f32 %v760_v59, 0.0  ;;  %v1474_v62 = vpop.f32.mrb[22].mxu1 }
 0x1dd   : > { %v775_v63 = vadd.f32 %v1474_v62, %v1298_v19  ;;  %v769_v0 = vpop.f32.mrb[23].mxu1 }
 0x1de   : > { %v770_v1 = vadd.f32 %v1298_v19, %v769_v0  ;;  %1501 = vmatprep.mubr.msk.f32.mxu0 %vm364_vm0, %v790_v61 }
 0x1df   : > { %v793_v2 = vmax.f32 %v775_v63, 0.0  ;;  %1502 = vmatmul.mubr.msk.f32.gmra.mrb[20].mxu0 %vm364_vm0, %v791_v60 }
 0x1e0   : > { %v792_v3 = vmax.f32 %v770_v1, 0.0 }
 0x1e2   : > { %1504 = vmatprep.mubr.msk.f32.mxu0 %vm364_vm0, %v792_v3 }
 0x1e3   : > { %1505 = vmatmul.mubr.msk.f32.gmra.mrb[22].mxu0 %vm364_vm0, %v793_v2 }
 0x29a   : > { %v1485_v5 = vpop.f32.mrb[8].mxu0 }
 0x29b   : > { %v925_v6 = vadd.f32 %v1485_v5, %v1795_v4  ;;  %v919_v7 = vpop.f32.mrb[9].mxu0 }
 0x29c   : > { %v920_v8 = vadd.f32 %v1795_v4, %v919_v7 }
 0x29d   : > { %v999_v10 = vmax.f32 %v925_v6, 0.0 }
 0x29e   : > { %v998_v11 = vmax.f32 %v920_v8, 0.0  ;;  %v1488_v12 = vpop.f32.mrb[10].mxu0 }
 0x29f   : > { %v935_v13 = vadd.f32 %v1488_v12, %v1795_v4  ;;  %v929_v14 = vpop.f32.mrb[11].mxu0  ;;  %v1022_v15 = vmul.f32 %v1802_v9, %v999_v10 }
 0x2a0   : > { %v930_v16 = vadd.f32 %v1795_v4, %v929_v14  ;;  %v1021_v19 = vmul.f32 %v1802_v9, %v998_v11 }
 0x2a1   : > { %v1001_v17 = vmax.f32 %v935_v13, 0.0  ;;  %v1040_v18 = vsel %vm364_vm0, %v1022_v15, 0.0 }
 0x2a2   : > { %v1000_v20 = vmax.f32 %v930_v16, 0.0  ;;  %1041 = vadd.xlane.f32.xlu0 %v1040_v18  ;;  %v1491_v21 = vpop.f32.mrb[12].mxu0  ;;  %v1037_v28 = vsel %vm364_vm0, %v1021_v19, 0.0 }
 0x2a3   : > { %v945_v22 = vadd.f32 %v1491_v21, %v1795_v4  ;;  %v939_v23 = vpop.f32.mrb[13].mxu0  ;;  %v1024_v24 = vmul.f32 %v1802_v9, %v1001_v17 }
 0x2a4   : > { %v940_v25 = vadd.f32 %v1795_v4, %v939_v23  ;;  %v1023_v29 = vmul.f32 %v1802_v9, %v1000_v20  ;;  %v1850_v23 = vstv %s1085_s30 }
 0x2a5   : > { %v1003_v26 = vmax.f32 %v945_v22, 0.0  ;;  %v1046_v27 = vsel %vm364_vm0, %v1024_v24, 0.0 }
 0x2a6   : > { %v1002_v30 = vmax.f32 %v940_v25, 0.0  ;;  %1047 = vadd.xlane.f32.xlu1 %v1046_v27  ;;  %v1494_v31 = vpop.f32.mrb[14].mxu0  ;;  %1038 = vadd.xlane.f32.xlu0 %v1037_v28  ;;  %v1043_v37 = vsel %vm364_vm0, %v1023_v29, 0.0 }
 0x2a7   : > { %v955_v32 = vadd.f32 %v1494_v31, %v1795_v4  ;;  %v949_v33 = vpop.f32.mrb[15].mxu0  ;;  %v1026_v38 = vmul.f32 %v1802_v9, %v1003_v26 }
 0x2a8   : > { %v950_v34 = vadd.f32 %v1795_v4, %v949_v33  ;;  %v1025_v35 = vmul.f32 %v1802_v9, %v1002_v30 }
 0x2a9   : > { %v1005_v36 = vmax.f32 %v955_v32, 0.0  ;;  %v1052_v47 = vsel %vm364_vm0, %v1026_v38, 0.0 }
 0x2aa   : > { %v1004_v39 = vmax.f32 %v950_v34, 0.0  ;;  %v1497_v40 = vpop.f32.mrb[16].mxu0  ;;  %1044 = vadd.xlane.f32.xlu1 %v1043_v37  ;;  %v1049_v41 = vsel %vm364_vm0, %v1025_v35, 0.0 }
 0x2ab   : > { %v965_v42 = vadd.f32 %v1497_v40, %v1795_v4  ;;  %v959_v43 = vpop.f32.mrb[17].mxu0  ;;  %1050 = vadd.xlane.f32.xlu0 %v1049_v41  ;;  %v1028_v48 = vmul.f32 %v1802_v9, %v1005_v36 }
 0x2ac   : > { %v960_v44 = vadd.f32 %v1795_v4, %v959_v43  ;;  %v1027_v45 = vmul.f32 %v1802_v9, %v1004_v39 }
 0x2ad   : > { %v1007_v46 = vmax.f32 %v965_v42, 0.0  ;;  %v1058_v57 = vsel %vm364_vm0, %v1028_v48, 0.0 }
 0x2ae   : > { %v1006_v49 = vmax.f32 %v960_v44, 0.0  ;;  %v1500_v50 = vpop.f32.mrb[18].mxu0  ;;  %1053 = vadd.xlane.f32.xlu1 %v1052_v47  ;;  %v1055_v51 = vsel %vm364_vm0, %v1027_v45, 0.0 }
 0x2af   : > { %v975_v52 = vadd.f32 %v1500_v50, %v1795_v4  ;;  %v969_v53 = vpop.f32.mrb[19].mxu0  ;;  %1056 = vadd.xlane.f32.xlu0 %v1055_v51  ;;  %v1030_v58 = vmul.f32 %v1802_v9, %v1007_v46 }
 0x2b0   : > { %v970_v54 = vadd.f32 %v1795_v4, %v969_v53  ;;  %v1029_v55 = vmul.f32 %v1802_v9, %v1006_v49 }
 0x2b1   : > { %v1009_v56 = vmax.f32 %v975_v52, 0.0  ;;  %v1064_v3 = vsel %vm364_vm0, %v1030_v58, 0.0 }
 0x2b2   : > { %v1008_v59 = vmax.f32 %v970_v54, 0.0  ;;  %v1503_v60 = vpop.f32.mrb[20].mxu0  ;;  %1059 = vadd.xlane.f32.xlu1 %v1058_v57  ;;  %v1061_v61 = vsel %vm364_vm0, %v1029_v55, 0.0 }
 0x2b3   : > { %v985_v62 = vadd.f32 %v1503_v60, %v1795_v4  ;;  %v979_v63 = vpop.f32.mrb[21].mxu0  ;;  %1062 = vadd.xlane.f32.xlu0 %v1061_v61  ;;  %v1032_v5 = vmul.f32 %v1802_v9, %v1009_v56 }
 0x2b4   : > { %v980_v0 = vadd.f32 %v1795_v4, %v979_v63  ;;  %v1031_v1 = vmul.f32 %v1802_v9, %v1008_v59 }
 0x2b5   : > { %v1011_v2 = vmax.f32 %v985_v62, 0.0  ;;  %v1070_v15 = vsel %vm364_vm0, %v1032_v5, 0.0 }
 0x2b6   : > { %v1010_v6 = vmax.f32 %v980_v0, 0.0  ;;  %v1506_v7 = vpop.f32.mrb[22].mxu0  ;;  %1065 = vadd.xlane.f32.xlu1 %v1064_v3  ;;  %v1067_v8 = vsel %vm364_vm0, %v1031_v1, 0.0 }
 0x2b7   : > { %v995_v10 = vadd.f32 %v1506_v7, %v1795_v4  ;;  %v989_v11 = vpop.f32.mrb[23].mxu0  ;;  %1068 = vadd.xlane.f32.xlu0 %v1067_v8  ;;  %v1034_v16 = vmul.f32 %v1802_v9, %v1011_v2 }
 0x2b8   : > { %v990_v12 = vadd.f32 %v1795_v4, %v989_v11  ;;  %v1033_v13 = vmul.f32 %v1802_v9, %v1010_v6 }
 0x2b9   : > { %v1013_v14 = vmax.f32 %v995_v10, 0.0  ;;  %v1076_v20 = vsel %vm364_vm0, %v1034_v16, 0.0 }
 0x2ba   : > { %v1012_v17 = vmax.f32 %v990_v12, 0.0  ;;  %1071 = vadd.xlane.f32.xlu1 %v1070_v15  ;;  %v1073_v18 = vsel %vm364_vm0, %v1033_v13, 0.0 }
 0x2bb   : > { %1074 = vadd.xlane.f32.xlu0 %v1073_v18  ;;  %v1036_v21 = vmul.f32 %v1802_v9, %v1013_v14 }
 0x2bc   : > { %v1035_v19 = vmul.f32 %v1802_v9, %v1012_v17 }
 0x2bd   : > { %v1082_v22 = vsel %vm364_vm0, %v1036_v21, 0.0 }
 0x2be   : > { %1077 = vadd.xlane.f32.xlu1 %v1076_v20  ;;  %v1079_v4 = vsel %vm364_vm0, %v1035_v19, 0.0 }
 0x2bf   : > { %1080 = vadd.xlane.f32.xlu0 %v1079_v4 }
 0x2c2   : > { %1083 = vadd.xlane.f32.xlu1 %v1082_v22 }
 0x32f   : > { %v1042_v24 = vpop.xlane.xlu0 %1041 }
 0x330   : > { %v1088_v25 = vadd.f32 %v1850_v23, %v1042_v24 }
 0x332   : > { %v1334_v26 = vmul.f32 -1.442695, %v1088_v25 }
 0x333   : > { %v1048_v27 = vpop.xlane.xlu1 %1047  ;;  %v1039_v28 = vpop.xlane.xlu0 %1038 }
 0x334   : > { %1543 = vpow2.f32 %v1334_v26  ;;  %v1090_v29 = vadd.f32 %v1850_v23, %v1048_v27  ;;  %v1087_v9 = vadd.f32 %v1850_v23, %v1039_v28 }
 0x336   : > { %v1336_v30 = vmul.f32 -1.442695, %v1090_v29  ;;  %v1333_v31 = vmul.f32 -1.442695, %v1087_v9 }
 0x337   : > { %v1045_v32 = vpop.xlane.xlu1 %1044 }
 0x338   : > { %1545 = vpow2.f32 %v1336_v30  ;;  %v1089_v33 = vadd.f32 %v1850_v23, %v1045_v32  ;;  %v1051_v34 = vpop.xlane.xlu0 %1050 }
 0x339   : > { %1547 = vpow2.f32 %v1333_v31  ;;  %v1091_v35 = vadd.f32 %v1850_v23, %v1051_v34 }
 0x33a   : > { %v1335_v36 = vmul.f32 -1.442695, %v1089_v33 }
 0x33b   : > { %v1337_v37 = vmul.f32 -1.442695, %v1091_v35  ;;  %v1054_v38 = vpop.xlane.xlu1 %1053 }
 0x33c   : > { %1549 = vpow2.f32 %v1335_v36  ;;  %v1092_v39 = vadd.f32 %v1850_v23, %v1054_v38  ;;  %v1057_v40 = vpop.xlane.xlu0 %1056 }
 0x33d   : > { %1551 = vpow2.f32 %v1337_v37  ;;  %v1093_v41 = vadd.f32 %v1850_v23, %v1057_v40 }
 0x33e   : > { %v1544_v42 = vpop.eup %1543  ;;  %v1338_v43 = vmul.f32 -1.442695, %v1092_v39 }
 0x33f   : > { %v1152_v44 = vadd.f32 1.0, %v1544_v42  ;;  %v1339_v45 = vmul.f32 -1.442695, %v1093_v41  ;;  %v1060_v46 = vpop.xlane.xlu1 %1059 }
 0x340   : > { %1553 = vpow2.f32 %v1338_v43  ;;  %v1094_v47 = vadd.f32 %v1850_v23, %v1060_v46  ;;  %v1063_v48 = vpop.xlane.xlu0 %1062 }
 0x341   : > { %1555 = vrcp.f32 %v1152_v44  ;;  %v1095_v49 = vadd.f32 %v1850_v23, %v1063_v48 }
 0x342   : > { %v1546_v50 = vpop.eup %1545  ;;  %1557 = vpow2.f32 %v1339_v45  ;;  %v1340_v51 = vmul.f32 -1.442695, %v1094_v47 }
 0x343   : > { %v1548_v52 = vpop.eup %1547  ;;  %v1154_v53 = vadd.f32 1.0, %v1546_v50  ;;  %v1341_v54 = vmul.f32 -1.442695, %v1095_v49  ;;  %v1066_v55 = vpop.xlane.xlu1 %1065 }
 0x344   : > { %v1151_v56 = vadd.f32 1.0, %v1548_v52  ;;  %1559 = vpow2.f32 %v1340_v51  ;;  %v1096_v57 = vadd.f32 %v1850_v23, %v1066_v55  ;;  %v1069_v58 = vpop.xlane.xlu0 %1068 }
 0x345   : > { %1561 = vrcp.f32 %v1154_v53  ;;  %v1097_v59 = vadd.f32 %v1850_v23, %v1069_v58 }
 0x346   : > { %v1550_v60 = vpop.eup %1549  ;;  %1563 = vrcp.f32 %v1151_v56  ;;  %v1342_v61 = vmul.f32 -1.442695, %v1096_v57 }
 0x347   : > { %v1552_v62 = vpop.eup %1551  ;;  %v1153_v63 = vadd.f32 1.0, %v1550_v60  ;;  %1565 = vpow2.f32 %v1341_v54  ;;  %v1343_v0 = vmul.f32 -1.442695, %v1097_v59  ;;  %v1072_v1 = vpop.xlane.xlu1 %1071 }
 0x348   : > { %v1155_v2 = vadd.f32 1.0, %v1552_v62  ;;  %1567 = vpow2.f32 %v1342_v61  ;;  %v1098_v3 = vadd.f32 %v1850_v23, %v1072_v1  ;;  %v1075_v5 = vpop.xlane.xlu0 %1074 }
 0x349   : > { %1569 = vrcp.f32 %v1153_v63  ;;  %v1099_v6 = vadd.f32 %v1850_v23, %v1075_v5 }
 0x34a   : > { %v1554_v7 = vpop.eup %1553  ;;  %1571 = vrcp.f32 %v1155_v2  ;;  %v1344_v8 = vmul.f32 -1.442695, %v1098_v3 }
 0x34b   : > { %v1556_v10 = vpop.eup %1555  ;;  %v1156_v11 = vadd.f32 1.0, %v1554_v7  ;;  %1573 = vpow2.f32 %v1343_v0  ;;  %v1345_v12 = vmul.f32 -1.442695, %v1099_v6  ;;  %v1078_v13 = vpop.xlane.xlu1 %1077 }
 0x34c   : > { %v1558_v14 = vpop.eup %1557  ;;  %1201 = vst.msk [vmem:[%s1869_s13 + $0x8] sm:$0xff] %vm1199_vm1, %v1556_v10  ;;  %1575 = vpow2.f32 %v1344_v8  ;;  %v1100_v15 = vadd.f32 %v1850_v23, %v1078_v13  ;;  %v1081_v16 = vpop.xlane.xlu0 %1080 }
 0x34d   : > { %1577 = vrcp.f32 %v1156_v11  ;;  %v1157_v17 = vadd.f32 1.0, %v1558_v14  ;;  %v1101_v18 = vadd.f32 %v1850_v23, %v1081_v16 }
 0x34e   : > { %v1560_v19 = vpop.eup %1559  ;;  %1579 = vpow2.f32 %v1345_v12  ;;  %v1346_v20 = vmul.f32 -1.442695, %v1100_v15 }
 0x34f   : > { %v1562_v21 = vpop.eup %1561  ;;  %1581 = vrcp.f32 %v1157_v17  ;;  %v1158_v4 = vadd.f32 1.0, %v1560_v19  ;;  %v1347_v22 = vmul.f32 -1.442695, %v1101_v18  ;;  %v1084_v24 = vpop.xlane.xlu1 %1083 }
 0x350   : > { %v1564_v25 = vpop.eup %1563  ;;  %1203 = vst.msk [vmem:[%s1869_s13 + $0x18] sm:$0xff] %vm1199_vm1, %v1562_v21  ;;  %1583 = vpow2.f32 %v1346_v20  ;;  %v1102_v26 = vadd.f32 %v1850_v23, %v1084_v24 }
 0x351   : > { %v1566_v27 = vpop.eup %1565  ;;  %1200 = vst.msk [vmem:[%s1869_s13] sm:$0xff] %vm1199_vm1, %v1564_v25  ;;  %1585 = vrcp.f32 %v1158_v4 }
 0x352   : > { %v1568_v28 = vpop.eup %1567  ;;  %v1159_v29 = vadd.f32 1.0, %v1566_v27  ;;  %1587 = vpow2.f32 %v1347_v22  ;;  %v1348_v9 = vmul.f32 -1.442695, %v1102_v26 }
 0x353   : > { %v1570_v30 = vpop.eup %1569  ;;  %v1160_v31 = vadd.f32 1.0, %v1568_v28 }
 0x354   : > { %v1572_v32 = vpop.eup %1571  ;;  %1202 = vst.msk [vmem:[%s1869_s13 + $0x10] sm:$0xff] %vm1199_vm1, %v1570_v30  ;;  %1589 = vrcp.f32 %v1159_v29 }
 0x355   : > { %v1574_v33 = vpop.eup %1573  ;;  %1204 = vst.msk [vmem:[%s1869_s13 + $0x20] sm:$0xff] %vm1199_vm1, %v1572_v32  ;;  %1591 = vrcp.f32 %v1160_v31 }
 0x356   : > { %v1576_v23 = vpop.eup %1575  ;;  %v1161_v34 = vadd.f32 1.0, %v1574_v33  ;;  %1593 = vpow2.f32 %v1348_v9 }
 0x357   : > { %v1578_v35 = vpop.eup %1577  ;;  %v1162_v36 = vadd.f32 1.0, %v1576_v23 }
 0x358   : > { %v1580_v37 = vpop.eup %1579  ;;  %1205 = vst.msk [vmem:[%s1869_s13 + $0x28] sm:$0xff] %vm1199_vm1, %v1578_v35  ;;  %1595 = vrcp.f32 %v1161_v34 }
 0x359   : > { %v1582_v38 = vpop.eup %1581  ;;  %1597 = vrcp.f32 %v1162_v36  ;;  %v1163_v39 = vadd.f32 1.0, %v1580_v37 }
 0x35a   : > { %v1584_v40 = vpop.eup %1583  ;;  %1206 = vst.msk [vmem:[%s1869_s13 + $0x30] sm:$0xff] %vm1199_vm1, %v1582_v38 }
 0x35b   : > { %v1586_v41 = vpop.eup %1585  ;;  %1599 = vrcp.f32 %v1163_v39  ;;  %v1164_v42 = vadd.f32 1.0, %v1584_v40 }
 0x35c   : > { %v1588_v43 = vpop.eup %1587  ;;  %1207 = vst.msk [vmem:[%s1869_s13 + $0x38] sm:$0xff] %vm1199_vm1, %v1586_v41 }
 0x35d   : > { %1601 = vrcp.f32 %v1164_v42  ;;  %v1165_v44 = vadd.f32 1.0, %v1588_v43 }
 0x35e   : > { %v1590_v45 = vpop.eup %1589 }
 0x35f   : > { %v1592_v46 = vpop.eup %1591  ;;  %1208 = vst.msk [vmem:[%s1869_s13 + $0x40] sm:$0xff] %vm1199_vm1, %v1590_v45  ;;  %1603 = vrcp.f32 %v1165_v44 }
 0x360   : > { %v1594_v47 = vpop.eup %1593  ;;  %1209 = vst.msk [vmem:[%s1869_s13 + $0x48] sm:$0xff] %vm1199_vm1, %v1592_v46 }
 0x361   : > { %v1166_v48 = vadd.f32 1.0, %v1594_v47 }
 0x362   : > { %v1596_v49 = vpop.eup %1595 }
 0x363   : > { %v1598_v50 = vpop.eup %1597  ;;  %1210 = vst.msk [vmem:[%s1869_s13 + $0x50] sm:$0xff] %vm1199_vm1, %v1596_v49  ;;  %1605 = vrcp.f32 %v1166_v48 }
 0x364   : > { %1211 = vst.msk [vmem:[%s1869_s13 + $0x58] sm:$0xff] %vm1199_vm1, %v1598_v50 }
 0x365   : > { %v1600_v51 = vpop.eup %1599 }
 0x366   : > { %1212 = vst.msk [vmem:[%s1869_s13 + $0x60] sm:$0xff] %vm1199_vm1, %v1600_v51 }
 0x367   : > { %v1602_v52 = vpop.eup %1601 }
 0x368   : > { %1213 = vst.msk [vmem:[%s1869_s13 + $0x68] sm:$0xff] %vm1199_vm1, %v1602_v52 }
 0x369   : > { %v1604_v53 = vpop.eup %1603 }
 0x36a   : > { %1214 = vst.msk [vmem:[%s1869_s13 + $0x70] sm:$0xff] %vm1199_vm1, %v1604_v53 }
 0x36d   : > { %v1606_v54 = vpop.eup %1605 }
 0x36e   : > { %1215 = vst.msk [vmem:[%s1869_s13 + $0x78] sm:$0xff] %vm1199_vm1, %v1606_v54 }
 0x36f PF: > { %s20_s11 = sadd.s32 1, %s1613_s11  }
 0x370   : > { %p17_p4 = scmp.ge.s32.totalorder %s20_s11, 4  }
 0x372   :  { %19 = sbr.rel (!%p17_p4) target bundleno = 2 (0x2), region = 86 }

</bundles_post_ra>
